<compile_context>
chip_gen: v7x
topology: tpu7x:2x2x1
jax: 0.10.0
libtpu: 0.0.40
codegen_flags: <defaults>
</compile_context>

<pallas_src>
import functools

import jax
import jax.numpy as jnp
from jax.experimental import pallas as pl
from jax.experimental.pallas import tpu as pltpu


def _round_up(x, m):
    return (x + m - 1) // m * m


def _epilogue_act(out, activation):
    if activation == "elu":
        return jnp.where(out > 0, out, jnp.expm1(jnp.minimum(out, 0.0)))
    if activation == "sigmoid":
        return jax.nn.sigmoid(out)
    return out


# ---------------------------------------------------------------------------
# Pallas kernel: matmul with fused bias + activation + per-tile channel stats.
#   A: (M, K) bf16   B: (K, N) bf16   bias: (1, N) f32
#   out: (M, N) out_dtype            stats: (grid_m, 2, N) f32 (sum, sum of squares)
# grid = (cdiv(M, tm),); full-K blocks (no reduction axis, no scratch).
# ---------------------------------------------------------------------------
def _mm_kernel(a_ref, b_ref, bias_ref, o_ref, stats_ref, *, activation, m_total, tm):
    acc = jnp.dot(a_ref[...], b_ref[...], preferred_element_type=jnp.float32)
    out = _epilogue_act(acc + bias_ref[...], activation)
    o_ref[...] = out.astype(o_ref.dtype)
    # masked per-tile channel stats (rows of the ragged last block are excluded)
    row = pl.program_id(0) * tm + jax.lax.broadcasted_iota(jnp.int32, out.shape, 0)
    om = jnp.where(row < m_total, out, 0.0)
    s1 = jnp.sum(om, axis=0, keepdims=True)           # (1, N)
    s2 = jnp.sum(om * om, axis=0, keepdims=True)      # (1, N)
    stats_ref[...] = jnp.concatenate([s1, s2], axis=0).reshape(1, 2, out.shape[1])


def matmul_bias_act(a, b, bias, activation="none", *, out_dtype=jnp.float32,
                    tm=512, min_pallas_m=256):
    """act(a @ b + bias) plus per-channel (sum, sumsq) over the M rows.

    a: (M, K), b: (K, N), bias: (N,).  Returns (out, colsum, colsumsq)."""
    M, K = a.shape
    Kb, N = b.shape
    assert Kb == K
    a = a.astype(jnp.bfloat16)
    b = b.astype(jnp.bfloat16)
    bias_f = bias.astype(jnp.float32)

    if M < min_pallas_m:
        # tiny M: launch-overhead dominated; keep in XLA (also no idle TC on v7x).
        out = jnp.dot(a, b, preferred_element_type=jnp.float32) + bias_f
        out = _epilogue_act(out, activation)
        return out.astype(out_dtype), jnp.sum(out, axis=0), jnp.sum(out * out, axis=0)

    tm = min(tm, _round_up(M, 8))
    tm = min(tm, _round_up(pl.cdiv(M, 2), 8))   # >= 2 grid blocks (feed both v7x TCs)
    grid_m = pl.cdiv(M, tm)

    out, stats = pl.pallas_call(
        functools.partial(_mm_kernel, activation=activation, m_total=M, tm=tm),
        out_shape=(jax.ShapeDtypeStruct((M, N), out_dtype),
                   jax.ShapeDtypeStruct((grid_m, 2, N), jnp.float32)),
        grid_spec=pltpu.PrefetchScalarGridSpec(
            num_scalar_prefetch=0,
            grid=(grid_m,),
            in_specs=[
                pl.BlockSpec((tm, K), lambda i: (i, 0)),
                pl.BlockSpec((K, N), lambda i: (0, 0)),
                pl.BlockSpec((1, N), lambda i: (0, 0)),
            ],
            out_specs=[
                pl.BlockSpec((tm, N), lambda i: (i, 0)),
                pl.BlockSpec((1, 2, N), lambda i: (i, 0, 0)),
            ]),
        compiler_params=pltpu.CompilerParams(dimension_semantics=("parallel",)),
    )(a, b, bias_f.reshape(1, N))
    return out, stats[:, 0, :].sum(axis=0), stats[:, 1, :].sum(axis=0)


# ---------------------------------------------------------------------------
# Conv / ConvTranspose glue (heavy math goes through the Pallas matmul)
# ---------------------------------------------------------------------------
def _im2col(x, kh, kw, stride):
    # x: NHWC (bf16) -> (B*OH*OW, kh*kw*C) with (kh, kw, c) patch ordering.
    B, H, W, C = x.shape
    oh = (H - kh) // stride + 1
    ow = (W - kw) // stride + 1
    cols = []
    for i in range(kh):
        for j in range(kw):
            cols.append(x[:, i:i + stride * oh:stride, j:j + stride * ow:stride, :])
    patches = jnp.concatenate(cols, axis=-1)
    return patches.reshape(B * oh * ow, kh * kw * C), oh, ow


def conv2d(x, wmat, bias, k, stride, pad, activation, out_dtype=jnp.bfloat16):
    # x: NHWC, wmat: (k*k*cin, cout) in (kh, kw, cin) order (bf16).
    x = x.astype(jnp.bfloat16)                       # cast BEFORE pad / im2col
    if pad:
        x = jnp.pad(x, ((0, 0), (pad, pad), (pad, pad), (0, 0)))
    B = x.shape[0]
    a, oh, ow = _im2col(x, k, k, stride)
    out, s1, s2 = matmul_bias_act(a, wmat, bias, activation, out_dtype=out_dtype)
    return out.reshape(B, oh, ow, -1), s1, s2, a.shape[0]


def _bn_from_stats(x, colsum, colsumsq, count, gamma, beta, eps=1e-5):
    # training-mode batch statistics (biased variance), like a fresh torch BN module.
    mean = colsum / count
    var = jnp.maximum(colsumsq / count - mean * mean, 0.0)
    scale = gamma * jax.lax.rsqrt(var + eps)
    return x.astype(jnp.float32) * scale + (beta - mean * scale)


def batchnorm_vec(x, gamma, beta, eps=1e-5):
    # XLA batchnorm over axis 0 for the tiny (batch, features) tensors.
    mean = jnp.mean(x, axis=0, keepdims=True)
    var = jnp.mean(jnp.square(x - mean), axis=0, keepdims=True)
    return (x - mean) * jax.lax.rsqrt(var + eps) * gamma + beta


def _phase_geometry(h_in, k, pad, r):
    """1-D geometry of stride-2 transposed-conv phase r (static Python math)."""
    h_out = (h_in - 1) * 2 - 2 * pad + k
    taps = -(-(k - r) // 2)                  # number of kernel taps in this phase
    q_min = pad + ((r - pad) % 2)
    j_min = (q_min - r) // 2
    q_max = pad + h_out - 1
    q_max -= (q_max - r) % 2
    oh = (q_max - r) // 2 - j_min + 1
    o_start = q_min - pad
    pad_lo = (taps - 1) - j_min
    pad_hi = (oh + taps - 1) - pad_lo - h_in
    assert pad_lo >= 0 and pad_hi >= 0
    return oh, o_start, pad_lo, pad_hi, taps, h_out


def _phase_weights_blockdiag(w):
    """ConvTranspose2d weight (cin, cout, kh, kw), stride 2 -> block-diagonal
    (4*Kp, 4*cout) bf16 matrix (one flipped stride-phase sub-kernel per block)."""
    cin, cout, kh, kw = w.shape
    assert kh % 2 == 0 and kw % 2 == 0 and kh == kw
    mats = []
    for ry in range(2):
        for rx in range(2):
            sub = w[:, :, ry::2, :][:, :, ::-1, :]
            sub = sub[:, :, :, rx::2][:, :, :, ::-1]
            ty, tx = sub.shape[2], sub.shape[3]
            mats.append(jnp.transpose(sub, (2, 3, 0, 1)).reshape(ty * tx * cin, cout))
    kp = mats[0].shape[0]
    big = jnp.zeros((4 * kp, 4 * cout), w.dtype)
    for p, m in enumerate(mats):
        big = big.at[p * kp:(p + 1) * kp, p * cout:(p + 1) * cout].set(m)
    return big.astype(jnp.bfloat16)


def conv_transpose2d(x, wbig, bias, k, pad, activation, out_dtype=jnp.bfloat16):
    """Stride-2 ConvTranspose2d via stride-phase decomposition, folded into ONE
    matmul: the 4 phase patch sets are concatenated along K and multiplied by the
    block-diagonal weight (lane-dense N = 4*cout), then interleaved by reshape."""
    x = x.astype(jnp.bfloat16)
    B, H, W, _ = x.shape
    cout = wbig.shape[1] // 4
    gy = [_phase_geometry(H, k, pad, r) for r in range(2)]
    gx = [_phase_geometry(W, k, pad, r) for r in range(2)]
    oh, ow = gy[0][0], gx[0][0]
    h_out, w_out = gy[0][-1], gx[0][-1]
    assert gy[1][0] == oh and gx[1][0] == ow
    assert 2 * oh == h_out and 2 * ow == w_out
    assert sorted([gy[0][1], gy[1][1]]) == [0, 1]
    assert sorted([gx[0][1], gx[1][1]]) == [0, 1]

    patches = []
    for ry in range(2):
        _, _, ply, phy, ty, _ = gy[ry]
        for rx in range(2):
            _, _, plx, phx, tx, _ = gx[rx]
            xp = jnp.pad(x, ((0, 0), (ply, phy), (plx, phx), (0, 0)))
            p, poh, pow_ = _im2col(xp, ty, tx, 1)
            assert (poh, pow_) == (oh, ow)
            patches.append(p)
    a = jnp.concatenate(patches, axis=1)                 # (M, 4*Kp) bf16
    bias4 = jnp.tile(bias.astype(jnp.float32), 4)        # phase-major (4*cout,)
    out, s1, s2 = matmul_bias_act(a, wbig, bias4, activation, out_dtype=out_dtype)

    # interleave (M, 4*cout) -> (B, h_out, w_out, cout): order phase axes by offset
    out6 = out.reshape(B, oh, ow, 2, 2, cout)
    if gy[0][1] == 1:          # phase ry=0 lands on odd output rows -> swap
        out6 = out6[:, :, :, ::-1]
    if gx[0][1] == 1:
        out6 = out6[:, :, :, :, ::-1]
    img = jnp.transpose(out6, (0, 1, 3, 2, 4, 5)).reshape(B, h_out, w_out, cout)

    csum = s1.reshape(4, cout).sum(axis=0)               # fold phases for BN stats
    csumsq = s2.reshape(4, cout).sum(axis=0)
    return img, csum, csumsq, 4 * a.shape[0]


# ---------------------------------------------------------------------------
# Parameters
# ---------------------------------------------------------------------------
def init_params(key, cfg):
    ks = iter(jax.random.split(key, 64))

    def w(shape, scale=0.05):
        return scale * jax.random.normal(next(ks), shape, jnp.float32)

    def b(shape):
        return 0.01 * jax.random.normal(next(ks), shape, jnp.float32)

    def bn(c):
        return (1.0 + 0.01 * jax.random.normal(next(ks), (c,), jnp.float32),
                0.01 * jax.random.normal(next(ks), (c,), jnp.float32))

    s, rin, rnn = cfg["s"], cfg["rnn_input_size"], cfg["rnn_size"]
    z, act = cfg["z_size"], cfg["action_size"]

    p = {}
    p["en"] = []
    for co, ci, k in [(64, 3, 8), (32, 64, 6), (32, 32, 6), (32, 32, 4)]:
        g, bt = bn(co)
        p["en"].append(dict(w=w((co, ci, k, k)), b=b((co,)), gamma=g, beta=bt))
    g, bt = bn(rin)
    p["en2"] = dict(w=w((rin, s)), b=b((rin,)), gamma=g, beta=bt)
    p["h2h"] = dict(w=w((rnn, rnn)), b=b((rnn,)))
    p["a2h"] = dict(w=w((rnn, act)), b=b((rnn,)))
    p["lstm"] = dict(w_ih=w((4 * rnn, rin)), w_hh=w((4 * rnn, rnn)),
                     b_ih=b((4 * rnn,)), b_hh=b((4 * rnn,)))
    p["mean"] = dict(w=w((z, rnn)), b=b((z,)))
    p["logvar"] = dict(w=w((z, rnn)), b=b((z,)))
    g1, bt1 = bn(z)
    g2, bt2 = bn(s)
    p["de"] = dict(gamma1=g1, beta1=bt1, w=w((s, z)), b=b((s,)),
                   gamma2=g2, beta2=bt2)
    p["de2"] = []
    for i, (ci, co, k) in enumerate([(32, 32, 4), (32, 32, 6), (32, 64, 6), (64, 6, 8)]):
        layer = dict(w=w((ci, co, k, k)), b=b((co,)))
        if i < 3:
            g, bt = bn(co)
            layer["gamma"], layer["beta"] = g, bt
        p["de2"].append(layer)
    return p


# ---------------------------------------------------------------------------
# One-time weight preparation (transposes, bf16 casts, phase splits) — hoisted
# out of the recurrent loops.
# ---------------------------------------------------------------------------
def _prepare(params):
    prep = {}
    prep["en"] = []
    for lp in params["en"]:
        co, ci, kh, kw = lp["w"].shape
        wmat = jnp.transpose(lp["w"], (2, 3, 1, 0)).reshape(kh * kw * ci, co)
        prep["en"].append(dict(wmat=wmat.astype(jnp.bfloat16), b=lp["b"],
                               gamma=lp["gamma"], beta=lp["beta"], k=kh))
    prep["de2"] = []
    for lp in params["de2"]:
        d = dict(wbig=_phase_weights_blockdiag(lp["w"]), b=lp["b"], k=lp["w"].shape[2])
        if "gamma" in lp:
            d["gamma"], d["beta"] = lp["gamma"], lp["beta"]
        prep["de2"].append(d)
    # tiny batch-size-2 linears stay in XLA: pre-transpose / pre-merge weights.
    prep["en2_w"], prep["en2_b"] = params["en2"]["w"].T, params["en2"]["b"]
    prep["en2_g"], prep["en2_bt"] = params["en2"]["gamma"], params["en2"]["beta"]
    prep["h2h_w"], prep["h2h_b"] = params["h2h"]["w"].T, params["h2h"]["b"]
    prep["a2h_w"], prep["a2h_b"] = params["a2h"]["w"].T, params["a2h"]["b"]
    prep["w_ih"] = params["lstm"]["w_ih"].T
    prep["w_hh"] = params["lstm"]["w_hh"].T
    prep["lstm_b"] = params["lstm"]["b_ih"] + params["lstm"]["b_hh"]
    prep["ml_w"] = jnp.concatenate([params["mean"]["w"], params["logvar"]["w"]], 0).T
    prep["ml_b"] = jnp.concatenate([params["mean"]["b"], params["logvar"]["b"]], 0)
    dp = params["de"]
    prep["de_g1"], prep["de_b1"] = dp["gamma1"], dp["beta1"]
    prep["de_w"], prep["de_b"] = dp["w"].T, dp["b"]
    prep["de_g2"], prep["de_b2"] = dp["gamma2"], dp["beta2"]
    return prep


EN_CFG = [(2, 0), (2, 1), (2, 1), (2, 0)]
DE_CFG = [(2, 0), (2, 1), (2, 1), (2, 0)]


# ---------------------------------------------------------------------------
# VFM forward
# ---------------------------------------------------------------------------
def vfm_forward(params, x, acts_encode, acts_decode, key, cfg):
    B, in_len, out_len = cfg["batch_size"], cfg["in_len"], cfg["out_len"]
    size, s, rnn_size = cfg["size"], cfg["s"], cfg["rnn_size"]
    z, H = cfg["z_size"], cfg["img_size"]
    prep = _prepare(params)

    def run_en(x_nchw):
        h = jnp.transpose(x_nchw, (0, 2, 3, 1))            # NCHW -> NHWC
        for lp, (st, pd) in zip(prep["en"], EN_CFG):
            y, s1, s2, cnt = conv2d(h, lp["wmat"], lp["b"], lp["k"], st, pd, "elu",
                                    out_dtype=jnp.bfloat16)
            h = _bn_from_stats(y, s1, s2, cnt, lp["gamma"], lp["beta"]).astype(jnp.bfloat16)
        return h                                            # (N, size, size, 32) bf16

    def run_en2(h_nhwc):
        # flatten in NCHW order to match `h.view(-1, s)` in the reference
        flat = jnp.transpose(h_nhwc, (0, 3, 1, 2)).reshape(-1, s).astype(jnp.float32)
        e = jax.nn.elu(flat @ prep["en2_w"] + prep["en2_b"])
        return batchnorm_vec(e, prep["en2_g"], prep["en2_bt"])

    def run_de2(d_flat):
        # view as NCHW (B, 32, size, size), decode back to an image
        h = jnp.transpose(d_flat.reshape(B, 32, size, size), (0, 2, 3, 1))
        for i, (lp, (st, pd)) in enumerate(zip(prep["de2"], DE_CFG)):
            if i < 3:
                img, s1, s2, cnt = conv_transpose2d(
                    h, lp["wbig"], lp["b"], lp["k"], pd, "elu", out_dtype=jnp.bfloat16)
                h = _bn_from_stats(img, s1, s2, cnt,
                                   lp["gamma"], lp["beta"]).astype(jnp.bfloat16)
            else:
                h, _, _, _ = conv_transpose2d(
                    h, lp["wbig"], lp["b"], lp["k"], pd, "sigmoid", out_dtype=jnp.float32)
        return jnp.transpose(h, (0, 3, 1, 2))               # NCHW (B, 6, H, H) f32

    def lstm_step(xin, h, c):
        gates = xin @ prep["w_ih"] + h @ prep["w_hh"] + prep["lstm_b"]
        i, f, g, o = jnp.split(gates, 4, axis=1)            # torch LSTMCell order
        c_new = jax.nn.sigmoid(f) * c + jax.nn.sigmoid(i) * jnp.tanh(g)
        return jax.nn.sigmoid(o) * jnp.tanh(c_new), c_new

    def hh_aa(h, act):
        return ((h @ prep["h2h_w"] + prep["h2h_b"]) *
                (act @ prep["a2h_w"] + prep["a2h_b"]))

    def decode_head(rnn_h, step):
        ml = rnn_h @ prep["ml_w"] + prep["ml_b"]            # fused mean | logvar
        mu, logvar = ml[:, :z], ml[:, z:]
        eps = jax.random.normal(jax.random.fold_in(key, step), mu.shape, jnp.float32)
        zz = eps * jnp.exp(0.5 * logvar) + mu               # reparameterize
        zb = batchnorm_vec(zz, prep["de_g1"], prep["de_b1"])
        d = jax.nn.elu(zb @ prep["de_w"] + prep["de_b"])
        d = batchnorm_vec(d, prep["de_g2"], prep["de_b2"])
        return run_de2(d), mu, logvar

    # ------------- encode the input sequence -------------
    x_flat = x.reshape(B * in_len, 3, H, H)
    img_enc = run_en2(run_en(x_flat)).reshape(B, in_len, -1)

    def enc_step(carry, xs):
        h, c = carry
        xin, act = xs
        h, c = lstm_step(xin, h, c)
        h = hh_aa(h, act)
        return (h, c), None

    (rnn_h, rnn_c), _ = jax.lax.scan(
        enc_step,
        (jnp.zeros((B, rnn_size), jnp.float32),
         jnp.zeros((B, rnn_size), jnp.float32)),
        (jnp.swapaxes(img_enc, 0, 1), jnp.swapaxes(acts_encode, 0, 1)))

    # ------------- autoregressive decode -------------
    img0, mu0, lv0 = decode_head(rnn_h, 0)
    enc0 = run_en2(run_en(img0[:, :3]))

    def dec_step(carry, xs):
        h, c, enc = carry
        act, step = xs
        h = hh_aa(h, act)
        h, c = lstm_step(enc, h, c)
        img, mu, lv = decode_head(h, step)
        enc = run_en2(run_en(img[:, :3]))
        return (h, c, enc), (img, mu, lv)

    _, (imgs, mus, lvs) = jax.lax.scan(
        dec_step, (rnn_h, rnn_c, enc0),
        (jnp.swapaxes(acts_decode[:, :out_len - 1], 0, 1),
         jnp.arange(1, out_len)))

    gen_imgs = jnp.concatenate([img0[:, None], jnp.swapaxes(imgs, 0, 1)], axis=1)
    means = jnp.concatenate([mu0[None], mus], axis=0)
    logvars = jnp.concatenate([lv0[None], lvs], axis=0)
    return gen_imgs, means, logvars                         # (B,T,6,H,H), (T,B,z), (T,B,z)


# ---------------------------------------------------------------------------
# Reference (lax) conv / conv-transpose for numeric equivalence checks
# ---------------------------------------------------------------------------
def _ref_conv2d(x, w_torch, bias, stride, pad):
    w_hwio = jnp.transpose(w_torch, (2, 3, 1, 0)).astype(jnp.bfloat16)
    y = jax.lax.conv_general_dilated(
        x.astype(jnp.bfloat16), w_hwio, window_strides=(stride, stride),
        padding=((pad, pad), (pad, pad)),
        dimension_numbers=("NHWC", "HWIO", "NHWC"),
        preferred_element_type=jnp.float32)
    return y + bias


def _ref_conv_transpose2d(x, w_torch, bias, pad):
    k = w_torch.shape[2]
    w_hwio = jnp.transpose(w_torch[:, :, ::-1, ::-1], (2, 3, 0, 1)).astype(jnp.bfloat16)
    y = jax.lax.conv_general_dilated(
        x.astype(jnp.bfloat16), w_hwio, window_strides=(1, 1),
        padding=((k - 1 - pad, k - 1 - pad),) * 2,
        lhs_dilation=(2, 2),
        dimension_numbers=("NHWC", "HWIO", "NHWC"),
        preferred_element_type=jnp.float32)
    return y + bias


# ---------------------------------------------------------------------------
if __name__ == "__main__":
    # --- numeric equivalence checks (exercise the Pallas kernel path, M >= 256) ---
    ck = jax.random.split(jax.random.PRNGKey(1), 6)
    xc = jax.random.uniform(ck[0], (2, 38, 38, 3), jnp.float32)
    wc = 0.05 * jax.random.normal(ck[1], (64, 3, 8, 8), jnp.float32)
    bc = 0.01 * jax.random.normal(ck[2], (64,), jnp.float32)
    wmat_c = jnp.transpose(wc, (2, 3, 1, 0)).reshape(8 * 8 * 3, 64).astype(jnp.bfloat16)
    got_c, _, _, _ = conv2d(xc, wmat_c, bc, 8, 2, 0, "none", out_dtype=jnp.float32)
    ref_c = _ref_conv2d(xc, wc, bc, 2, 0)
    assert got_c.shape == ref_c.shape
    assert bool(jnp.allclose(got_c, ref_c, atol=1e-2, rtol=1e-2)), \
        float(jnp.max(jnp.abs(got_c - ref_c)))

    xt = jax.random.uniform(ck[3], (2, 12, 12, 32), jnp.float32)
    wt = 0.05 * jax.random.normal(ck[4], (32, 16, 6, 6), jnp.float32)
    bt = 0.01 * jax.random.normal(ck[5], (16,), jnp.float32)
    wbig_t = _phase_weights_blockdiag(wt)
    got_t, _, _, _ = conv_transpose2d(xt, wbig_t, bt, 6, 1, "none", out_dtype=jnp.float32)
    ref_t = _ref_conv_transpose2d(xt, wt, bt, 1)
    assert got_t.shape == ref_t.shape
    assert bool(jnp.allclose(got_t, ref_t, atol=1e-2, rtol=1e-2)), \
        float(jnp.max(jnp.abs(got_t - ref_t)))

    # --- full forward pass ---
    # small configuration keeping the reference's structural constraint
    # img_size = 16*size + 34 (210 <-> size 11 in the original).
    size = 2
    cfg = dict(img_size=16 * size + 34, action_size=2, z_size=32,
               rnn_input_size=64, rnn_size=128, batch_size=2,
               in_len=2, out_len=2, size=size, s=32 * size * size)

    key = jax.random.PRNGKey(0)
    pkey, xkey, aekey, adkey, nkey = jax.random.split(key, 5)
    params = init_params(pkey, cfg)

    B, T_in, T_out, H = cfg["batch_size"], cfg["in_len"], cfg["out_len"], cfg["img_size"]
    x = jax.random.uniform(xkey, (B, T_in, 3, H, H), jnp.float32)
    acts_encode = jax.random.normal(aekey, (B, T_in, cfg["action_size"]), jnp.float32)
    acts_decode = jax.random.normal(adkey, (B, T_out, cfg["action_size"]), jnp.float32)

    fwd = jax.jit(lambda p, xx, ae, ad, k: vfm_forward(p, xx, ae, ad, k, cfg))
    out, mean, logvar = fwd(params, x, acts_encode, acts_decode, nkey)
    jax.block_until_ready(out)

    assert out.shape == (B, T_out, 6, H, H), out.shape
    assert mean.shape == (T_out, B, cfg["z_size"]), mean.shape
    assert logvar.shape == (T_out, B, cfg["z_size"]), logvar.shape
    assert bool(jnp.all(jnp.isfinite(out)))
    assert bool(jnp.all(out >= 0)) and bool(jnp.all(out <= 1))
    print("KERNEL_OK")
</pallas_src>

<mosaic_0001>
module attributes {stable_mosaic.version = 11 : i64} {
  func.func @_mm_kernel(%arg0: i32, %arg1: memref<256x192xbf16, #tpu.memory_space<vmem>>, %arg2: memref<192x64xbf16, #tpu.memory_space<vmem>>, %arg3: memref<1x64xf32, #tpu.memory_space<vmem>>, %arg4: memref<256x64xf32, #tpu.memory_space<vmem>>, %arg5: memref<1x2x64xf32, #tpu.memory_space<vmem>>) attributes {dimension_semantics = [#tpu.dimension_semantics<parallel>], iteration_bounds = array<i64: 2>, scalar_prefetch = 0 : i64, scratch_operands = 0 : i64, tpu.core_type = #tpu.core_type<tc>, window_params = [{transform_indices = @transform_0, window_bounds = array<i64: 256, 192>}, {pipeline_mode = #tpu.pipeline_mode<synchronous>, transform_indices = @transform_1, window_bounds = array<i64: 192, 64>}, {pipeline_mode = #tpu.pipeline_mode<synchronous>, transform_indices = @transform_2, window_bounds = array<i64: 1, 64>}, {transform_indices = @transform_3, window_bounds = array<i64: 256, 64>}, {transform_indices = @transform_4, window_bounds = array<i64: 1, 2, 64>}]} {
    %c0 = arith.constant 0 : index
    %c0_0 = arith.constant 0 : index
    %0 = vector.load %arg1[%c0, %c0_0] : memref<256x192xbf16, #tpu.memory_space<vmem>>, vector<256x192xbf16>
    %c0_1 = arith.constant 0 : index
    %c0_2 = arith.constant 0 : index
    %1 = vector.load %arg2[%c0_1, %c0_2] : memref<192x64xbf16, #tpu.memory_space<vmem>>, vector<192x64xbf16>
    %cst = arith.constant dense<0.000000e+00> : vector<256x64xf32>
    %2 = tpu.matmul %0, %1, %cst {dimension_numbers = #tpu.dot_dimension_numbers<[1], [0], [0], [1], [0, 0, 1, 1], [], []>} : vector<256x192xbf16>, vector<192x64xbf16>, vector<256x64xf32> -> vector<256x64xf32>
    %c0_3 = arith.constant 0 : index
    %c0_4 = arith.constant 0 : index
    %3 = vector.load %arg3[%c0_3, %c0_4] : memref<1x64xf32, #tpu.memory_space<vmem>>, vector<1x64xf32>
    %4 = vector.broadcast %3 : vector<1x64xf32> to vector<256x64xf32>
    %5 = arith.addf %2, %4 : vector<256x64xf32>
    %c0_5 = arith.constant 0 : index
    %c0_6 = arith.constant 0 : index
    %6 = vector.load %arg4[%c0_5, %c0_6] : memref<256x64xf32, #tpu.memory_space<vmem>>, vector<256x64xf32>
    tpu.vector_store %arg4[%c0_5, %c0_6], %5 {strides = array<i32>} : memref<256x64xf32, #tpu.memory_space<vmem>>, vector<256x64xf32>,
    %c256_i32 = arith.constant 256 : i32
    %7 = arith.muli %arg0, %c256_i32 : i32
    %8 = tpu.iota {dimensions = array<i32: 0>} : vector<256x64xi32>
    %9 = vector.broadcast %7 : i32 to vector<256x64xi32>
    %10 = arith.addi %9, %8 : vector<256x64xi32>
    %c512_i32 = arith.constant 512 : i32
    %11 = vector.broadcast %c512_i32 : i32 to vector<256x64xi32>
    %12 = arith.cmpi slt, %10, %11 : vector<256x64xi32>
    %cst_7 = arith.constant 0.000000e+00 : f32
    %13 = vector.broadcast %cst_7 : f32 to vector<256x64xf32>
    %14 = arith.select %12, %5, %13 : vector<256x64xi1>, vector<256x64xf32>
    %cst_8 = arith.constant dense<0.000000e+00> : vector<64xf32>
    %15 = vector.multi_reduction <add>, %14, %cst_8 [0] : vector<256x64xf32> to vector<64xf32>
    %16 = vector.shape_cast %15 : vector<64xf32> to vector<1x64xf32>
    %17 = arith.mulf %14, %14 : vector<256x64xf32>
    %cst_9 = arith.constant dense<0.000000e+00> : vector<64xf32>
    %18 = vector.multi_reduction <add>, %17, %cst_9 [0] : vector<256x64xf32> to vector<64xf32>
    %19 = vector.shape_cast %18 : vector<64xf32> to vector<1x64xf32>
    %20 = tpu.concatenate %16, %19 in 0 : vector<1x64xf32>, vector<1x64xf32> -> vector<2x64xf32>
    %21 = vector.shape_cast %20 : vector<2x64xf32> to vector<1x2x64xf32>
    %c0_10 = arith.constant 0 : index
    %c0_11 = arith.constant 0 : index
    %c0_12 = arith.constant 0 : index
    %22 = vector.load %arg5[%c0_10, %c0_11, %c0_12] : memref<1x2x64xf32, #tpu.memory_space<vmem>>, vector<1x2x64xf32>
    tpu.vector_store %arg5[%c0_10, %c0_11, %c0_12], %21 {strides = array<i32>} : memref<1x2x64xf32, #tpu.memory_space<vmem>>, vector<1x2x64xf32>,
    return
  }
  func.func @transform_0(%arg0: i32) -> (i32, i32) {
    %c0_i32 = arith.constant 0 : i32
    %c0_i32_0 = arith.constant 0 : i32
    return %arg0, %c0_i32 : i32, i32
  }
  func.func @transform_1(%arg0: i32) -> (i32, i32) {
    %c0_i32 = arith.constant 0 : i32
    %c0_i32_0 = arith.constant 0 : i32
    %c0_i32_1 = arith.constant 0 : i32
    return %c0_i32, %c0_i32_0 : i32, i32
  }
  func.func @transform_2(%arg0: i32) -> (i32, i32) {
    %c0_i32 = arith.constant 0 : i32
    %c0_i32_0 = arith.constant 0 : i32
    %c0_i32_1 = arith.constant 0 : i32
    return %c0_i32, %c0_i32_0 : i32, i32
  }
  func.func @transform_3(%arg0: i32) -> (i32, i32) {
    %c0_i32 = arith.constant 0 : i32
    %c0_i32_0 = arith.constant 0 : i32
    return %arg0, %c0_i32 : i32, i32
  }
  func.func @transform_4(%arg0: i32) -> (i32, i32, i32) {
    %c0_i32 = arith.constant 0 : i32
    %c0_i32_0 = arith.constant 0 : i32
    %c0_i32_1 = arith.constant 0 : i32
    return %arg0, %c0_i32, %c0_i32_0 : i32, i32, i32
  }
}

</mosaic_0001>

<bundles_post_ra>
// kernel: tpu_custom_call.1
= control target key start
LH: loop header
LB: loop body
LE: loop exit
PB: predicated region body
PF: predicated region fallthrough
CT: control target
= control target key end

     0   :  { %10 = vsyncpa [#allocation3], 0  ;;  %s2014_s0 = inlined_call_operand.vmem [shape: bf16[512,192], index: 0, kind: input, shape index: {}]   ;;  %s2015_s1 = inlined_call_operand.vmem [shape: bf16[192,64], index: 1, kind: input, shape index: {}]   ;;  %s2016_s2 = inlined_call_operand.vmem [shape: f32[1,64], index: 2, kind: input, shape index: {}]   ;;  %s2017_s3 = inlined_call_operand.vmem [shape: f32[512,64], index: 3, kind: output, shape index: {0}]   ;;  %s2018_s4 = inlined_call_operand.hbm [shape: f32[2,2,64], index: 4, kind: output, shape index: {1}]  }
   0x1   :  { %12 = vsyncpa [#allocation3 + $0x1], 0  ;;  %s1441_s15 = smov 0   ;;  %s1443_s16 = smov 0  }
   0x2   :  { %s1445_s17 = smov 0   ;;  %s1447_s18 = smov 0  }
   0x3 LB: > { %s1462_s19 = sadd.s32 4294967295, %s1412_s18   ;;  %s1149_s20 = sadd.s32 4294967294, %s1412_s18   ;;  %s1412_s18 = sphi %s1447_s18, %s2024_s18   ;;  %s1408_s17 = sphi %s1445_s17, %s2023_s17   ;;  %s1404_s16 = sphi %s1443_s16, %s2022_s16   ;;  %s1400_s15 = sphi %s1441_s15, %s2021_s15  }
   0x4   : > { %s1466_s21 = sadd.s32 1, %s1412_s18   ;;  %s119_s22 = sadd.s32 1, %s1408_s17 }
   0x5   : > { %s116_s23 = ssub.s32 %s1412_s18, %s1466_s21  ;;  %p129_p0 = scmp.ne.s32.totalorder %s1408_s17, %s1404_s16 }
   0x6   : > { %p117_p1 = scmp.eq.s32.totalorder %s116_s23, 0  ;;  %p130_p2 = scmp.eq.s32.totalorder %s1462_s19, 1 }
   0x7   : > { %p135_p3 = scmp.ne.s32.totalorder %s1404_s16, %s1400_s15  ;;  %p136_p4 = scmp.eq.s32.totalorder %s1149_s20, 1 }
   0x8   : > { %s1477_s24 = scalar_select %p117_p1, %s1408_s17, %s119_s22  }
   0x9   : > { %p1479_p5 = por %p130_p2, %p129_p0  ;;  %p1483_p6 = por %p136_p4, %p135_p3 }
   0xa   : > { %p1152_p7 = scmp.ge.s32.totalorder %s1412_s18, 1  ;;  %p170_p8 = scmp.lt.s32.totalorder %s1412_s18, 3 }
   0xc   : > { %p171_p9 = pnand %p1152_p7, %p170_p8 }
   0xd   : > { %v1290_v0 = vld [vmem:[%s2015_s1] sm:$0xff] (!%p171_p9)   ;;  %v1414_v1 = vmov (!%p171_p9), 0   ;;  %s1495_s29 = sshll.u32 (!%p171_p9), %s1462_s19, 5  ;;  %v1291_v2 = vld [vmem:[%s2015_s1 + $0x8] sm:$0xff] (!%p171_p9)   ;;  %v1292_v3 = vld [vmem:[%s2015_s1 + $0x10] sm:$0xff] (!%p171_p9)   ;;  %vm495_vm0 = vcmask (!%p171_p9), 523264   ;;  %v738_v45 = vlaneseq (!%p171_p9) }
   0xe   : > { %174 = sbr.rel (%p171_p9) target bundleno = 399 (0x18f), region = 32  ;;  %544 = vmatprep.subr.bf16.mxu0 (!%p171_p9), %v1414_v1  ;;  %1226 = vmatprep.subr.bf16.mxu1 (!%p171_p9), %v1414_v1  ;;  %p203_p10 = scmp.lt.s32.totalorder (!%p171_p9), %s1495_s29, 63  ;;  %v1293_v4 = vld [vmem:[%s2015_s1 + $0x18] sm:$0xff] (!%p171_p9)   ;;  %v1294_v6 = vld [vmem:[%s2015_s1 + $0x20] sm:$0xff] (!%p171_p9)   ;;  %v1295_v7 = vld [vmem:[%s2015_s1 + $0x28] sm:$0xff] (!%p171_p9)  }
   0xf   : > { %545 = vmatpush1.bf16.msra.mxu0 (!%p171_p9), %v1290_v0  ;;  %1238 = vmatpush1.bf16.msra.mxu1 (!%p171_p9), %v1290_v0  ;;  %v1296_v9 = vld [vmem:[%s2015_s1 + $0x30] sm:$0xff] (!%p171_p9)   ;;  %v1297_v10 = vld [vmem:[%s2015_s1 + $0x38] sm:$0xff] (!%p171_p9)   ;;  %v1298_v11 = vld [vmem:[%s2015_s1 + $0x40] sm:$0xff] (!%p171_p9)   ;;  %s1220_s27 = sshll.u32 (!%p171_p9), %s1462_s19, 8  ;;  %v1613_v46 = vshrl.u32 (!%p171_p9), %v738_v45, 7  ;;  %s1972_s12 = scalar_lea.hbm (!%p171_p9), %s2018_s4, %s1495_s29 }
  0x10   : > { %546 = vmatprep.subr.bf16.mxu0 (!%p171_p9), %v1414_v1  ;;  %1227 = vmatprep.subr.bf16.mxu1 (!%p171_p9), %v1414_v1  ;;  %v1299_v12 = vld [vmem:[%s2015_s1 + $0x48] sm:$0xff] (!%p171_p9)   ;;  %v1300_v13 = vld [vmem:[%s2015_s1 + $0x50] sm:$0xff] (!%p171_p9)   ;;  %v1301_v14 = vld [vmem:[%s2015_s1 + $0x58] sm:$0xff] (!%p171_p9)   ;;  %v1615_v47 = vstv (!%p171_p9), %s1220_s27  ;;  %s1415_s22 = smov (!%p171_p9), [#allocation2]  }
  0x11   : > { %v740_v48 = vadd.s32 (!%p171_p9), 8, %v1613_v46  ;;  %v772_v49 = vadd.s32 (!%p171_p9), %v1615_v47, %v1613_v46  ;;  %v1623_v50 = vld [vmem:[%s2016_s2] ss:$0 sm:$0xff] (!%p171_p9)  ;;  %v741_v53 = vadd.s32 (!%p171_p9), 16, %v1613_v46  ;;  %v742_v60 = vadd.s32 (!%p171_p9), 24, %v1613_v46  ;;  %s1354_s23 = sshll.u32 (!%p171_p9), %s1415_s22, 4  ;;  %s1355_s23 = int_to_ptr.vmem [resolvable:$false] %s1354_s23 }
  0x12   : > { %s1356_s27 = scalar_lea.vmem (!%p171_p9), %s1355_s23, 64 }
  0x13   : > { %547 = vmatpush1.bf16.msra.mxu0 (!%p171_p9), %v1291_v2  ;;  %1239 = vmatpush1.bf16.msra.mxu1 (!%p171_p9), %v1291_v2  ;;  %v773_v51 = vadd.s32 (!%p171_p9), %v1615_v47, %v740_v48  ;;  %vm804_vm1 = vcmp.lt.s32.totalorder (!%p171_p9), %v772_v49, 512 }
  0x14   : > { %548 = vmatprep.subr.bf16.mxu0 (!%p171_p9), %v1414_v1  ;;  %1228 = vmatprep.subr.bf16.mxu1 (!%p171_p9), %v1414_v1 }
  0x15   : > { %s1504_s6 = scalar_select %p203_p10, %s1495_s29, 63  ;;  %vm805_vm2 = vcmp.lt.s32.totalorder %v773_v51, 512 }
  0x17   : > { %s1225_s9 = sshll.u32 %s1504_s6, 3  ;;  %549 = vmatpush1.bf16.msra.mxu0 %v1292_v3  ;;  %1240 = vmatpush1.bf16.msra.mxu1 %v1292_v3  ;;  %s199_s6 = sand.u32 1, %s1404_s16  }
  0x18   : > { %s1520_s14 = scalar_lea.vmem %s2014_s0, %s1225_s9  ;;  %550 = vmatprep.subr.bf16.mxu0 %v1414_v1  ;;  %1229 = vmatprep.subr.bf16.mxu1 %v1414_v1  ;;  %s1631_s19 = scalar_lea.vmem %s2017_s3, %s1225_s9 }
  0x19   : > { %v1304_v5 = vld [vmem:[%s1520_s14 + $0x4] ss:$8 sps:$4 sm:$0xff]   ;;  %v1302_v15 = vld [vmem:[%s1520_s14] ss:$8 sps:$4 sm:$0xff]   ;;  %v1305_v17 = vld [vmem:[%s1520_s14 + $0x14] ss:$8 sps:$4 sm:$0xff]  }
  0x1a   : > { %1204 = vmatprep.mubr.msk.bf16.mxu0 %vm495_vm0, %v1304_v5  ;;  %v1316_v8 = vld [vmem:[%s1520_s14 + $0x84] ss:$8 sps:$4 sm:$0xff]   ;;  %v1314_v16 = vld [vmem:[%s1520_s14 + $0x80] ss:$8 sps:$4 sm:$0xff]   ;;  %v1320_v18 = vld [vmem:[%s1520_s14 + $0x94] ss:$8 sps:$4 sm:$0xff]  }
  0x1b   : > { %551 = vmatpush1.bf16.msra.mxu0 %v1293_v4  ;;  %1241 = vmatpush1.bf16.msra.mxu1 %v1293_v4  ;;  %v1307_v19 = vld [vmem:[%s1520_s14 + $0x10] ss:$8 sps:$4 sm:$0xff]   ;;  %v1308_v21 = vld [vmem:[%s1520_s14 + $0x24] ss:$8 sps:$4 sm:$0xff]   ;;  %v1310_v23 = vld [vmem:[%s1520_s14 + $0x20] ss:$8 sps:$4 sm:$0xff]   ;;  %v774_v4 = vadd.s32 %v1615_v47, %v741_v53 }
  0x1c   : > { %552 = vmatprep.subr.bf16.mxu0 %v1414_v1  ;;  %1230 = vmatprep.subr.bf16.mxu1 %v1414_v1  ;;  %v1322_v20 = vld [vmem:[%s1520_s14 + $0x90] ss:$8 sps:$4 sm:$0xff]   ;;  %v1326_v22 = vld [vmem:[%s1520_s14 + $0xa4] ss:$8 sps:$4 sm:$0xff]   ;;  %v1328_v24 = vld [vmem:[%s1520_s14 + $0xa0] ss:$8 sps:$4 sm:$0xff]  }
  0x1d   : > { %1212 = vmatprep.mubr.msk.bf16.mxu1 %vm495_vm0, %v1316_v8  ;;  %v1311_v25 = vld [vmem:[%s1520_s14 + $0x34] ss:$8 sps:$4 sm:$0xff]   ;;  %v1313_v27 = vld [vmem:[%s1520_s14 + $0x30] ss:$8 sps:$4 sm:$0xff]   ;;  %v1317_v29 = vld [vmem:[%s1520_s14 + $0x44] ss:$8 sps:$4 sm:$0xff]  }
  0x1e   : > { %v1332_v26 = vld [vmem:[%s1520_s14 + $0xb4] ss:$8 sps:$4 sm:$0xff]   ;;  %v1334_v28 = vld [vmem:[%s1520_s14 + $0xb0] ss:$8 sps:$4 sm:$0xff]   ;;  %v1338_v30 = vld [vmem:[%s1520_s14 + $0xc4] ss:$8 sps:$4 sm:$0xff]  }
  0x1f   : > { %553 = vmatpush1.bf16.msra.mxu0 %v1294_v6  ;;  %1242 = vmatpush1.bf16.msra.mxu1 %v1294_v6  ;;  %v1319_v31 = vld [vmem:[%s1520_s14 + $0x40] ss:$8 sps:$4 sm:$0xff]   ;;  %v1323_v33 = vld [vmem:[%s1520_s14 + $0x54] ss:$8 sps:$4 sm:$0xff]   ;;  %v1325_v35 = vld [vmem:[%s1520_s14 + $0x50] ss:$8 sps:$4 sm:$0xff]  }
  0x20   : > { %554 = vmatprep.subr.bf16.mxu0 %v1414_v1  ;;  %1231 = vmatprep.subr.bf16.mxu1 %v1414_v1  ;;  %v1340_v32 = vld [vmem:[%s1520_s14 + $0xc0] ss:$8 sps:$4 sm:$0xff]   ;;  %v1341_v34 = vld [vmem:[%s1520_s14 + $0xd4] ss:$8 sps:$4 sm:$0xff]   ;;  %v1343_v36 = vld [vmem:[%s1520_s14 + $0xd0] ss:$8 sps:$4 sm:$0xff]  }
  0x21   : > { %v1329_v37 = vld [vmem:[%s1520_s14 + $0x64] ss:$8 sps:$4 sm:$0xff]   ;;  %v1331_v39 = vld [vmem:[%s1520_s14 + $0x60] ss:$8 sps:$4 sm:$0xff]   ;;  %v1335_v41 = vld [vmem:[%s1520_s14 + $0x74] ss:$8 sps:$4 sm:$0xff]  }
  0x22   : > { %v1344_v38 = vld [vmem:[%s1520_s14 + $0xe4] ss:$8 sps:$4 sm:$0xff]   ;;  %v1346_v40 = vld [vmem:[%s1520_s14 + $0xe0] ss:$8 sps:$4 sm:$0xff]   ;;  %v1347_v42 = vld [vmem:[%s1520_s14 + $0xf4] ss:$8 sps:$4 sm:$0xff]  }
  0x23   : > { %555 = vmatpush1.bf16.msra.mxu0 %v1295_v7  ;;  %1243 = vmatpush1.bf16.msra.mxu1 %v1295_v7  ;;  %v1337_v43 = vld [vmem:[%s1520_s14 + $0x70] ss:$8 sps:$4 sm:$0xff]   ;;  %vm806_vm3 = vcmp.lt.s32.totalorder %v774_v4, 512  ;;  %v746_v53 = vadd.s32 56, %v1613_v46  ;;  %s1153_s9 = sshll.u32 %s199_s6, 1  ;;  %s1048_s13 = scalar_lea.sflag [#allocation3], %s199_s6 }
  0x24   : > { %556 = vmatprep.subr.bf16.mxu0 %v1414_v1  ;;  %1232 = vmatprep.subr.bf16.mxu1 %v1414_v1  ;;  %v1349_v44 = vld [vmem:[%s1520_s14 + $0xf0] ss:$8 sps:$4 sm:$0xff]   ;;  %s201_s7 = scalar_lea.vmem [#allocation2], %s1153_s9 }
  0x25   : > { %s1065_s8 = sshll.u32 %s201_s7, 4  ;;  %s1974_s8 = int_to_ptr.vmem [resolvable:$true] %s1065_s8 }
  0x26   : > { %s1350_s20 = scalar_lea.vmem %s1974_s8, 32  ;;  %p1357_p0 = scmp.lt.s32.totalorder %s1974_s8, %s1355_s23 }
  0x27   : > { %557 = vmatpush1.bf16.msra.mxu0 %v1296_v9  ;;  %1244 = vmatpush1.bf16.msra.mxu1 %v1296_v9  ;;  %v775_v9 = vadd.s32 %v1615_v47, %v742_v60  ;;  %p1351_p11 = scmp.ne.s32.totalorder %s1974_s8, %s1350_s20  ;;  %p1358_p1 = scmp.lt.s32.totalorder %s1356_s27, %s1350_s20 }
  0x28   : > { %558 = vmatprep.subr.bf16.mxu0 %v1414_v1  ;;  %1233 = vmatprep.subr.bf16.mxu1 %v1414_v1 }
  0x29   : > { %vm807_vm4 = vcmp.lt.s32.totalorder %v775_v9, 512  ;;  %p1352_p12 = pnand %p1351_p11, %p1479_p5  ;;  %p1359_p2 = por %p1358_p1, %p1357_p0 }
  0x2b   : > { %559 = vmatpush1.bf16.msra.mxu0 %v1297_v10  ;;  %1245 = vmatpush1.bf16.msra.mxu1 %v1297_v10  ;;  %p1353_p13 = pneg %p1352_p12 }
  0x2c   : > { %560 = vmatprep.subr.bf16.mxu0 %v1414_v1  ;;  %1234 = vmatprep.subr.bf16.mxu1 %v1414_v1 }
  0x2d   : > { %p1360_p3 = pnand %p1359_p2, %p1353_p13 }
  0x2f   : > { %561 = vmatpush1.bf16.msra.mxu0 %v1298_v11  ;;  %1246 = vmatpush1.bf16.msra.mxu1 %v1298_v11 }
  0x30   : > { %562 = vmatprep.subr.bf16.mxu0 %v1414_v1  ;;  %1235 = vmatprep.subr.bf16.mxu1 %v1414_v1 }
  0x33   : > { %563 = vmatpush1.bf16.msra.mxu0 %v1299_v12  ;;  %1247 = vmatpush1.bf16.msra.mxu1 %v1299_v12 }
  0x34   : > { %564 = vmatprep.subr.bf16.mxu0 %v1414_v1  ;;  %1236 = vmatprep.subr.bf16.mxu1 %v1414_v1 }
  0x37   : > { %565 = vmatpush1.bf16.msra.mxu0 %v1300_v13  ;;  %1248 = vmatpush1.bf16.msra.mxu1 %v1300_v13 }
  0x38   : > { %566 = vmatprep.subr.bf16.mxu0 %v1414_v1  ;;  %1237 = vmatprep.subr.bf16.mxu1 %v1414_v1 }
  0x3b   : > { %567 = vmatpush1.bf16.msra.mxu0 %v1301_v14  ;;  %1249 = vmatpush1.bf16.msra.mxu1 %v1301_v14  ;;  %v743_v14 = vadd.s32 32, %v1613_v46 }
  0x3e   : > { %577 = vmatmul.mubr.bf16.vlgmr.msra.gmra.mrb[0].mxu0 %v1302_v15  ;;  %641 = vmatmul.mubr.bf16.vlgmr.msra.gmra.mrb[0].mxu1 %v1314_v16 }
  0x3f   : > { %1205 = vmatprep.mubr.msk.bf16.mxu0 %vm495_vm0, %v1305_v17  ;;  %1213 = vmatprep.mubr.msk.bf16.mxu1 %vm495_vm0, %v1320_v18 }
  0x46   : > { %585 = vmatmul.mubr.bf16.gmra.mrb[4].mxu0 %v1307_v19  ;;  %649 = vmatmul.mubr.bf16.gmra.mrb[4].mxu1 %v1322_v20 }
  0x47   : > { %1206 = vmatprep.mubr.msk.bf16.mxu0 %vm495_vm0, %v1308_v21  ;;  %1214 = vmatprep.mubr.msk.bf16.mxu1 %vm495_vm0, %v1326_v22  ;;  %v744_v22 = vadd.s32 40, %v1613_v46 }
  0x4e   : > { %593 = vmatmul.mubr.bf16.gmra.mrb[8].mxu0 %v1310_v23  ;;  %657 = vmatmul.mubr.bf16.gmra.mrb[8].mxu1 %v1328_v24 }
  0x4f   : > { %1207 = vmatprep.mubr.msk.bf16.mxu0 %vm495_vm0, %v1311_v25  ;;  %1215 = vmatprep.mubr.msk.bf16.mxu1 %vm495_vm0, %v1332_v26 }
  0x56   : > { %601 = vmatmul.mubr.bf16.gmra.mrb[12].mxu0 %v1313_v27  ;;  %665 = vmatmul.mubr.bf16.gmra.mrb[12].mxu1 %v1334_v28 }
  0x57   : > { %1208 = vmatprep.mubr.msk.bf16.mxu0 %vm495_vm0, %v1317_v29  ;;  %1216 = vmatprep.mubr.msk.bf16.mxu1 %vm495_vm0, %v1338_v30 }
  0x5e   : > { %609 = vmatmul.mubr.bf16.gmra.mrb[16].mxu0 %v1319_v31  ;;  %673 = vmatmul.mubr.bf16.gmra.mrb[16].mxu1 %v1340_v32  ;;  %v776_v31 = vadd.s32 %v1615_v47, %v743_v14 }
  0x5f   : > { %1209 = vmatprep.mubr.msk.bf16.mxu0 %vm495_vm0, %v1323_v33  ;;  %1217 = vmatprep.mubr.msk.bf16.mxu1 %vm495_vm0, %v1341_v34 }
  0x60   : > { %vm808_vm5 = vcmp.lt.s32.totalorder %v776_v31, 512 }
  0x66   : > { %617 = vmatmul.mubr.bf16.gmra.mrb[20].mxu0 %v1325_v35  ;;  %681 = vmatmul.mubr.bf16.gmra.mrb[20].mxu1 %v1343_v36 }
  0x67   : > { %1210 = vmatprep.mubr.msk.bf16.mxu0 %vm495_vm0, %v1329_v37  ;;  %1218 = vmatprep.mubr.msk.bf16.mxu1 %vm495_vm0, %v1344_v38  ;;  %v777_v37 = vadd.s32 %v1615_v47, %v744_v22 }
  0x69   : > { %vm809_vm6 = vcmp.lt.s32.totalorder %v777_v37, 512 }
  0x6e   : > { %625 = vmatmul.mubr.bf16.gmra.mrb[24].mxu0 %v1331_v39  ;;  %689 = vmatmul.mubr.bf16.gmra.mrb[24].mxu1 %v1346_v40 }
  0x6f   : > { %1211 = vmatprep.mubr.msk.bf16.mxu0 %vm495_vm0, %v1335_v41  ;;  %1219 = vmatprep.mubr.msk.bf16.mxu1 %vm495_vm0, %v1347_v42  ;;  %v745_v42 = vadd.s32 48, %v1613_v46 }
  0x76   : > { %633 = vmatmul.mubr.bf16.gmra.mrb[28].mxu0 %v1337_v43  ;;  %697 = vmatmul.mubr.bf16.gmra.mrb[28].mxu1 %v1349_v44 }
 0x111   : > { %v578_v52 = vpop.f32.mrb[0].mxu0  ;;  %v642_v54 = vpop.f32.mrb[0].mxu1 }
 0x112   : > { %v579_v55 = vadd.f32 %v1623_v50, %v578_v52  ;;  %v580_v56 = vpop.f32.mrb[1].mxu0  ;;  %v1636_v57 = vadd.f32 %v1623_v50, %v642_v54  ;;  %v644_v58 = vpop.f32.mrb[1].mxu1 }
 0x113   : > { %v581_v59 = vpop.f32.mrb[2].mxu0  ;;  %v645_v61 = vpop.f32.mrb[2].mxu1 }
 0x114   : > { %705 = vst.msk [vmem:[%s1631_s19] sm:$0xff] %vm495_vm0, %v579_v55  ;;  %v836_v62 = vsel %vm804_vm1, %v579_v55, 0.0  ;;  %v582_v63 = vadd.f32 %v1623_v50, %v581_v59  ;;  %v583_v0 = vpop.f32.mrb[3].mxu0  ;;  %721 = vst.msk [vmem:[%s1631_s19 + $0x80] sm:$0xff] %vm495_vm0, %v1636_v57  ;;  %v1646_v1 = vadd.f32 %v1623_v50, %v645_v61  ;;  %v647_v2 = vpop.f32.mrb[3].mxu1 }
 0x115   : > { %v937_v3 = vmul.f32 %v836_v62, %v836_v62  ;;  %v868_v6 = vsel %vm495_vm0, %v836_v62, 0.0 }
 0x116   : > { %706 = vst.msk [vmem:[%s1631_s19 + $0x8] sm:$0xff] %vm495_vm0, %v582_v63  ;;  %v837_v5 = vsel %vm805_vm2, %v582_v63, 0.0  ;;  %722 = vst.msk [vmem:[%s1631_s19 + $0x88] sm:$0xff] %vm495_vm0, %v1646_v1  ;;  %v778_v63 = vadd.s32 %v1615_v47, %v745_v42 }
 0x117   : > { %v869_v7 = vsel %vm495_vm0, %v837_v5, 0.0  ;;  %v938_v8 = vmul.f32 %v837_v5, %v837_v5  ;;  %v969_v11 = vsel %vm495_vm0, %v937_v3, 0.0 }
 0x118   : > { %v870_v10 = vadd.f32 %v869_v7, %v868_v6  ;;  %v779_v6 = vadd.s32 %v1615_v47, %v746_v53  ;;  %vm810_vm7 = vcmp.lt.s32.totalorder %v778_v63, 512  ;;  %v750_v53 = vadd.s32 88, %v1613_v46 }
 0x119   : > { %v970_v12 = vsel %vm495_vm0, %v938_v8, 0.0  ;;  %v586_v13 = vpop.f32.mrb[4].mxu0  ;;  %v650_v15 = vpop.f32.mrb[4].mxu1 }
 0x11a   : > { %v971_v16 = vadd.f32 %v970_v12, %v969_v11  ;;  %v587_v17 = vadd.f32 %v1623_v50, %v586_v13  ;;  %v588_v18 = vpop.f32.mrb[5].mxu0  ;;  %v1662_v19 = vadd.f32 %v1623_v50, %v650_v15  ;;  %v652_v20 = vpop.f32.mrb[5].mxu1  ;;  %v747_v11 = vadd.s32 64, %v1613_v46 }
 0x11b   : > { %v589_v21 = vpop.f32.mrb[6].mxu0  ;;  %v653_v23 = vpop.f32.mrb[6].mxu1  ;;  %vm811_vm8 = vcmp.lt.s32.totalorder %v779_v6, 512  ;;  %v748_v20 = vadd.s32 72, %v1613_v46 }
 0x11c   : > { %707 = vst.msk [vmem:[%s1631_s19 + $0x10] sm:$0xff] %vm495_vm0, %v587_v17  ;;  %v838_v24 = vsel %vm806_vm3, %v587_v17, 0.0  ;;  %v590_v25 = vadd.f32 %v1623_v50, %v589_v21  ;;  %v591_v26 = vpop.f32.mrb[7].mxu0  ;;  %723 = vst.msk [vmem:[%s1631_s19 + $0x90] sm:$0xff] %vm495_vm0, %v1662_v19  ;;  %v1672_v27 = vadd.f32 %v1623_v50, %v653_v23  ;;  %v655_v28 = vpop.f32.mrb[7].mxu1 }
 0x11d   : > { %v871_v29 = vsel %vm495_vm0, %v838_v24, 0.0  ;;  %v939_v30 = vmul.f32 %v838_v24, %v838_v24 }
 0x11e   : > { %v872_v32 = vadd.f32 %v871_v29, %v870_v10  ;;  %708 = vst.msk [vmem:[%s1631_s19 + $0x18] sm:$0xff] %vm495_vm0, %v590_v25  ;;  %v839_v33 = vsel %vm807_vm4, %v590_v25, 0.0  ;;  %724 = vst.msk [vmem:[%s1631_s19 + $0x98] sm:$0xff] %vm495_vm0, %v1672_v27 }
 0x11f   : > { %v972_v34 = vsel %vm495_vm0, %v939_v30, 0.0  ;;  %v873_v35 = vsel %vm495_vm0, %v839_v33, 0.0  ;;  %v940_v36 = vmul.f32 %v839_v33, %v839_v33  ;;  %v780_v30 = vadd.s32 %v1615_v47, %v747_v11 }
 0x120   : > { %v973_v38 = vadd.f32 %v972_v34, %v971_v16  ;;  %v874_v39 = vadd.f32 %v873_v35, %v872_v32 }
 0x121   : > { %v974_v40 = vsel %vm495_vm0, %v940_v36, 0.0  ;;  %v594_v41 = vpop.f32.mrb[8].mxu0  ;;  %v658_v43 = vpop.f32.mrb[8].mxu1  ;;  %v781_v36 = vadd.s32 %v1615_v47, %v748_v20  ;;  %vm812_vm9 = vcmp.lt.s32.totalorder %v780_v30, 512 }
 0x122   : > { %v975_v44 = vadd.f32 %v974_v40, %v973_v38  ;;  %v595_v45 = vadd.f32 %v1623_v50, %v594_v41  ;;  %v596_v48 = vpop.f32.mrb[9].mxu0  ;;  %v1688_v49 = vadd.f32 %v1623_v50, %v658_v43  ;;  %v660_v51 = vpop.f32.mrb[9].mxu1  ;;  %v749_v41 = vadd.s32 80, %v1613_v46 }
 0x123   : > { %v597_v52 = vpop.f32.mrb[10].mxu0  ;;  %v661_v54 = vpop.f32.mrb[10].mxu1  ;;  %vm813_vm10 = vcmp.lt.s32.totalorder %v781_v36, 512 }
 0x124   : > { %709 = vst.msk [vmem:[%s1631_s19 + $0x20] sm:$0xff] %vm495_vm0, %v595_v45  ;;  %v840_v55 = vsel %vm808_vm5, %v595_v45, 0.0  ;;  %v598_v56 = vadd.f32 %v1623_v50, %v597_v52  ;;  %v599_v58 = vpop.f32.mrb[11].mxu0  ;;  %725 = vst.msk [vmem:[%s1631_s19 + $0xa0] sm:$0xff] %vm495_vm0, %v1688_v49  ;;  %v1698_v59 = vadd.f32 %v1623_v50, %v661_v54  ;;  %v663_v60 = vpop.f32.mrb[11].mxu1 }
 0x125   : > { %v875_v61 = vsel %vm495_vm0, %v840_v55, 0.0  ;;  %v941_v62 = vmul.f32 %v840_v55, %v840_v55 }
 0x126   : > { %v876_v0 = vadd.f32 %v875_v61, %v874_v39  ;;  %710 = vst.msk [vmem:[%s1631_s19 + $0x28] sm:$0xff] %vm495_vm0, %v598_v56  ;;  %v841_v2 = vsel %vm809_vm6, %v598_v56, 0.0  ;;  %726 = vst.msk [vmem:[%s1631_s19 + $0xa8] sm:$0xff] %vm495_vm0, %v1698_v59 }
 0x127   : > { %v976_v3 = vsel %vm495_vm0, %v941_v62, 0.0  ;;  %v877_v4 = vsel %vm495_vm0, %v841_v2, 0.0  ;;  %v942_v5 = vmul.f32 %v841_v2, %v841_v2 }
 0x128   : > { %v977_v7 = vadd.f32 %v976_v3, %v975_v44  ;;  %v878_v8 = vadd.f32 %v877_v4, %v876_v0  ;;  %v782_v0 = vadd.s32 %v1615_v47, %v749_v41 }
 0x129   : > { %v978_v9 = vsel %vm495_vm0, %v942_v5, 0.0  ;;  %v602_v10 = vpop.f32.mrb[12].mxu0  ;;  %v666_v12 = vpop.f32.mrb[12].mxu1 }
 0x12a   : > { %v979_v13 = vadd.f32 %v978_v9, %v977_v7  ;;  %v603_v14 = vadd.f32 %v1623_v50, %v602_v10  ;;  %v604_v15 = vpop.f32.mrb[13].mxu0  ;;  %v1714_v16 = vadd.f32 %v1623_v50, %v666_v12  ;;  %v668_v17 = vpop.f32.mrb[13].mxu1  ;;  %v783_v7 = vadd.s32 %v1615_v47, %v750_v53 }
 0x12b   : > { %v605_v18 = vpop.f32.mrb[14].mxu0  ;;  %v669_v21 = vpop.f32.mrb[14].mxu1  ;;  %v755_v10 = vadd.s32 128, %v1613_v46  ;;  %vm814_vm11 = vcmp.lt.s32.totalorder %v782_v0, 512  ;;  %v759_v53 = vadd.s32 160, %v1613_v46 }
 0x12c   : > { %711 = vst.msk [vmem:[%s1631_s19 + $0x30] sm:$0xff] %vm495_vm0, %v603_v14  ;;  %v842_v22 = vsel %vm810_vm7, %v603_v14, 0.0  ;;  %v606_v23 = vadd.f32 %v1623_v50, %v605_v18  ;;  %v607_v24 = vpop.f32.mrb[15].mxu0  ;;  %727 = vst.msk [vmem:[%s1631_s19 + $0xb0] sm:$0xff] %vm495_vm0, %v1714_v16  ;;  %v1724_v25 = vadd.f32 %v1623_v50, %v669_v21  ;;  %v671_v26 = vpop.f32.mrb[15].mxu1  ;;  %vm815_vm12 = vcmp.lt.s32.totalorder %v783_v7, 512 }
 0x12d   : > { %v879_v28 = vsel %vm495_vm0, %v842_v22, 0.0  ;;  %v943_v29 = vmul.f32 %v842_v22, %v842_v22  ;;  %v756_v26 = vadd.s32 136, %v1613_v46  ;;  %v754_v7 = vadd.s32 120, %v1613_v46 }
 0x12e   : > { %v880_v31 = vadd.f32 %v879_v28, %v878_v8  ;;  %712 = vst.msk [vmem:[%s1631_s19 + $0x38] sm:$0xff] %vm495_vm0, %v606_v23  ;;  %v843_v32 = vsel %vm811_vm8, %v606_v23, 0.0  ;;  %728 = vst.msk [vmem:[%s1631_s19 + $0xb8] sm:$0xff] %vm495_vm0, %v1724_v25  ;;  %v752_v23 = vadd.s32 104, %v1613_v46 }
 0x12f   : > { %v980_v33 = vsel %vm495_vm0, %v943_v29, 0.0  ;;  %v881_v34 = vsel %vm495_vm0, %v843_v32, 0.0  ;;  %v944_v35 = vmul.f32 %v843_v32, %v843_v32 }
 0x130   : > { %v981_v37 = vadd.f32 %v980_v33, %v979_v13  ;;  %v882_v38 = vadd.f32 %v881_v34, %v880_v31  ;;  %v751_v13 = vadd.s32 96, %v1613_v46  ;;  %v1781_v33 = vadd.s32 %v1615_v47, %v755_v10 }
 0x131   : > { %v982_v39 = vsel %vm495_vm0, %v944_v35, 0.0  ;;  %v610_v40 = vpop.f32.mrb[16].mxu0  ;;  %v674_v42 = vpop.f32.mrb[16].mxu1 }
 0x132   : > { %v983_v43 = vadd.f32 %v982_v39, %v981_v37  ;;  %v611_v44 = vadd.f32 %v1623_v50, %v610_v40  ;;  %v612_v45 = vpop.f32.mrb[17].mxu0  ;;  %v1740_v48 = vadd.f32 %v1623_v50, %v674_v42  ;;  %v676_v51 = vpop.f32.mrb[17].mxu1  ;;  %v784_v36 = vadd.s32 %v1615_v47, %v751_v13 }
 0x133   : > { %v613_v52 = vpop.f32.mrb[18].mxu0  ;;  %v677_v54 = vpop.f32.mrb[18].mxu1  ;;  %v757_v37 = vadd.s32 144, %v1613_v46  ;;  %v1797_v45 = vadd.s32 %v1615_v47, %v756_v26  ;;  %vm820_vm13 = vcmp.lt.s32.totalorder %v1781_v33, 512  ;;  %v762_v26 = vadd.s32 184, %v1613_v46 }
 0x134   : > { %713 = vst.msk [vmem:[%s1631_s19 + $0x40] sm:$0xff] %vm495_vm0, %v611_v44  ;;  %v844_v55 = vsel %vm812_vm9, %v611_v44, 0.0  ;;  %v614_v56 = vadd.f32 %v1623_v50, %v613_v52  ;;  %v615_v58 = vpop.f32.mrb[19].mxu0  ;;  %729 = vst.msk [vmem:[%s1631_s19 + $0xc0] sm:$0xff] %vm495_vm0, %v1740_v48  ;;  %v1750_v60 = vadd.f32 %v1623_v50, %v677_v54  ;;  %v679_v61 = vpop.f32.mrb[19].mxu1  ;;  %v785_v44 = vadd.s32 %v1615_v47, %v752_v23 }
 0x135   : > { %v883_v62 = vsel %vm495_vm0, %v844_v55, 0.0  ;;  %v945_v63 = vmul.f32 %v844_v55, %v844_v55  ;;  %vm816_vm14 = vcmp.lt.s32.totalorder %v784_v36, 512  ;;  %vm821_vm1 = vcmp.lt.s32.totalorder %v1797_v45, 512 }
 0x136   : > { %v884_v2 = vadd.f32 %v883_v62, %v882_v38  ;;  %714 = vst.msk [vmem:[%s1631_s19 + $0x48] sm:$0xff] %vm495_vm0, %v614_v56  ;;  %v845_v3 = vsel %vm813_vm10, %v614_v56, 0.0  ;;  %730 = vst.msk [vmem:[%s1631_s19 + $0xc8] sm:$0xff] %vm495_vm0, %v1750_v60  ;;  %v758_v38 = vadd.s32 152, %v1613_v46  ;;  %v753_v56 = vadd.s32 112, %v1613_v46 }
 0x137   : > { %v984_v4 = vsel %vm495_vm0, %v945_v63, 0.0  ;;  %v885_v5 = vsel %vm495_vm0, %v845_v3, 0.0  ;;  %v946_v6 = vmul.f32 %v845_v3, %v845_v3  ;;  %v760_v62 = vadd.s32 168, %v1613_v46 }
 0x138   : > { %v985_v8 = vadd.f32 %v984_v4, %v983_v43  ;;  %v886_v9 = vadd.f32 %v885_v5, %v884_v2  ;;  %v1809_v4 = vadd.s32 %v1615_v47, %v757_v37  ;;  %v1812_v5 = vadd.s32 %v1615_v47, %v758_v38 }
 0x139   : > { %v986_v11 = vsel %vm495_vm0, %v946_v6, 0.0  ;;  %v618_v12 = vpop.f32.mrb[20].mxu0  ;;  %v682_v14 = vpop.f32.mrb[20].mxu1  ;;  %vm817_vm15 = vcmp.lt.s32.totalorder %v785_v44, 512 }
 0x13a   : > { %v987_v15 = vadd.f32 %v986_v11, %v985_v8  ;;  %v619_v17 = vadd.f32 %v1623_v50, %v618_v12  ;;  %v620_v18 = vpop.f32.mrb[21].mxu0  ;;  %v1767_v20 = vadd.f32 %v1623_v50, %v682_v14  ;;  %v684_v21 = vpop.f32.mrb[21].mxu1  ;;  %vm822_vm2 = vcmp.lt.s32.totalorder %v1809_v4, 512 }
 0x13b   : > { %v621_v22 = vpop.f32.mrb[22].mxu0  ;;  %v685_v24 = vpop.f32.mrb[22].mxu1  ;;  %v761_v18 = vadd.s32 176, %v1613_v46  ;;  %v786_v21 = vadd.s32 %v1615_v47, %v753_v56  ;;  %vm823_vm3 = vcmp.lt.s32.totalorder %v1812_v5, 512  ;;  %v766_v4 = vadd.s32 216, %v1613_v46 }
 0x13c   : > { %715 = vst.msk [vmem:[%s1631_s19 + $0x50] sm:$0xff] %vm495_vm0, %v619_v17  ;;  %v846_v28 = vsel %vm814_vm11, %v619_v17, 0.0  ;;  %v622_v29 = vadd.f32 %v1623_v50, %v621_v22  ;;  %v623_v30 = vpop.f32.mrb[23].mxu0  ;;  %731 = vst.msk [vmem:[%s1631_s19 + $0xd0] sm:$0xff] %vm495_vm0, %v1767_v20  ;;  %v1778_v31 = vadd.f32 %v1623_v50, %v685_v24  ;;  %v687_v32 = vpop.f32.mrb[23].mxu1  ;;  %v1832_v22 = vadd.s32 %v1615_v47, %v760_v62 }
 0x13d   : > { %v887_v34 = vsel %vm495_vm0, %v846_v28, 0.0  ;;  %v947_v35 = vmul.f32 %v846_v28, %v846_v28  ;;  %v787_v32 = vadd.s32 %v1615_v47, %v754_v7  ;;  %v1849_v37 = vadd.s32 %v1615_v47, %v761_v18 }
 0x13e   : > { %v888_v39 = vadd.f32 %v887_v34, %v886_v9  ;;  %716 = vst.msk [vmem:[%s1631_s19 + $0x58] sm:$0xff] %vm495_vm0, %v622_v29  ;;  %v847_v40 = vsel %vm815_vm12, %v622_v29, 0.0  ;;  %732 = vst.msk [vmem:[%s1631_s19 + $0xd8] sm:$0xff] %vm495_vm0, %v1778_v31  ;;  %v1816_v9 = vadd.s32 %v1615_v47, %v759_v53  ;;  %vm818_vm4 = vcmp.lt.s32.totalorder %v786_v21, 512 }
 0x13f   : > { %v988_v41 = vsel %vm495_vm0, %v947_v35, 0.0  ;;  %v889_v42 = vsel %vm495_vm0, %v847_v40, 0.0  ;;  %v948_v43 = vmul.f32 %v847_v40, %v847_v40  ;;  %vm825_vm6 = vcmp.lt.s32.totalorder %v1832_v22, 512 }
 0x140   : > { %v989_v51 = vadd.f32 %v988_v41, %v987_v15  ;;  %v890_v52 = vadd.f32 %v889_v42, %v888_v39  ;;  %vm824_vm5 = vcmp.lt.s32.totalorder %v1816_v9, 512  ;;  %vm819_vm7 = vcmp.lt.s32.totalorder %v787_v32, 512 }
 0x141   : > { %v990_v54 = vsel %vm495_vm0, %v948_v43, 0.0  ;;  %v626_v55 = vpop.f32.mrb[24].mxu0  ;;  %v690_v58 = vpop.f32.mrb[24].mxu1  ;;  %v763_v53 = vadd.s32 192, %v1613_v46  ;;  %vm826_vm8 = vcmp.lt.s32.totalorder %v1849_v37, 512 }
 0x142   : > { %v991_v61 = vadd.f32 %v990_v54, %v989_v51  ;;  %v627_v63 = vadd.f32 %v1623_v50, %v626_v55  ;;  %v628_v0 = vpop.f32.mrb[25].mxu0  ;;  %v1806_v2 = vadd.f32 %v1623_v50, %v690_v58  ;;  %v692_v3 = vpop.f32.mrb[25].mxu1  ;;  %v1858_v51 = vadd.s32 %v1615_v47, %v762_v26 }
 0x143   : > { %v629_v6 = vpop.f32.mrb[26].mxu0  ;;  %v693_v8 = vpop.f32.mrb[26].mxu1  ;;  %v852_v55 = vsel %vm820_vm13, %v1636_v57, 0.0  ;;  %v764_v0 = vadd.s32 200, %v1613_v46  ;;  %v853_v3 = vsel %vm821_vm1, %v1646_v1, 0.0  ;;  %v854_v1 = vsel %vm822_vm2, %v1662_v19, 0.0 }
 0x144   : > { %717 = vst.msk [vmem:[%s1631_s19 + $0x60] sm:$0xff] %vm495_vm0, %v627_v63  ;;  %v848_v10 = vsel %vm816_vm14, %v627_v63, 0.0  ;;  %v630_v11 = vadd.f32 %v1623_v50, %v629_v6  ;;  %v631_v12 = vpop.f32.mrb[27].mxu0  ;;  %733 = vst.msk [vmem:[%s1631_s19 + $0xe0] sm:$0xff] %vm495_vm0, %v1806_v2  ;;  %v1826_v13 = vadd.f32 %v1623_v50, %v693_v8  ;;  %v695_v14 = vpop.f32.mrb[27].mxu1  ;;  %v953_v8 = vmul.f32 %v852_v55, %v852_v55 }
 0x145   : > { %v891_v15 = vsel %vm495_vm0, %v848_v10, 0.0  ;;  %v949_v17 = vmul.f32 %v848_v10, %v848_v10  ;;  %vm827_vm9 = vcmp.lt.s32.totalorder %v1858_v51, 512  ;;  %v954_v18 = vmul.f32 %v853_v3, %v853_v3 }
 0x146   : > { %v892_v23 = vadd.f32 %v891_v15, %v890_v52  ;;  %718 = vst.msk [vmem:[%s1631_s19 + $0x68] sm:$0xff] %vm495_vm0, %v630_v11  ;;  %v849_v24 = vsel %vm817_vm15, %v630_v11, 0.0  ;;  %734 = vst.msk [vmem:[%s1631_s19 + $0xe8] sm:$0xff] %vm495_vm0, %v1826_v13  ;;  %v796_v15 = vadd.s32 %v1615_v47, %v763_v53  ;;  %v1000_v19 = vsel %vm495_vm0, %v953_v8, 0.0 }
 0x147   : > { %v992_v28 = vsel %vm495_vm0, %v949_v17, 0.0  ;;  %v893_v29 = vsel %vm495_vm0, %v849_v24, 0.0  ;;  %v950_v30 = vmul.f32 %v849_v24, %v849_v24  ;;  %v899_v17 = vsel %vm495_vm0, %v852_v55, 0.0 }
 0x148   : > { %v993_v34 = vadd.f32 %v992_v28, %v991_v61  ;;  %v894_v35 = vadd.f32 %v893_v29, %v892_v23  ;;  %v797_v23 = vadd.s32 %v1615_v47, %v764_v0  ;;  %v855_v24 = vsel %vm823_vm3, %v1672_v27, 0.0 }
 0x149   : > { %v994_v36 = vsel %vm495_vm0, %v950_v30, 0.0  ;;  %v634_v38 = vpop.f32.mrb[28].mxu0  ;;  %v698_v39 = vpop.f32.mrb[28].mxu1  ;;  %v901_v29 = vsel %vm495_vm0, %v853_v3, 0.0  ;;  %v955_v30 = vmul.f32 %v854_v1, %v854_v1  ;;  %vm828_vm10 = vcmp.lt.s32.totalorder %v796_v15, 512 }
 0x14a   : > { %v995_v40 = vadd.f32 %v994_v36, %v993_v34  ;;  %v635_v41 = vadd.f32 %v1623_v50, %v634_v38  ;;  %v636_v42 = vpop.f32.mrb[29].mxu0  ;;  %v1854_v43 = vadd.f32 %v1623_v50, %v698_v39  ;;  %v700_v44 = vpop.f32.mrb[29].mxu1  ;;  %v856_v34 = vsel %vm824_vm5, %v1688_v49, 0.0 }
 0x14b   : > { %v637_v52 = vpop.f32.mrb[30].mxu0  ;;  %v701_v54 = vpop.f32.mrb[30].mxu1  ;;  %v1002_v27 = vsel %vm495_vm0, %v954_v18, 0.0  ;;  %v903_v5 = vsel %vm495_vm0, %v854_v1, 0.0  ;;  %v956_v38 = vmul.f32 %v855_v24, %v855_v24  ;;  %vm829_vm11 = vcmp.lt.s32.totalorder %v797_v23, 512 }
 0x14c   : > { %719 = vst.msk [vmem:[%s1631_s19 + $0x70] sm:$0xff] %vm495_vm0, %v635_v41  ;;  %v850_v56 = vsel %vm818_vm4, %v635_v41, 0.0  ;;  %v638_v58 = vadd.f32 %v1623_v50, %v637_v52  ;;  %v639_v61 = vpop.f32.mrb[31].mxu0  ;;  %735 = vst.msk [vmem:[%s1631_s19 + $0xf0] sm:$0xff] %vm495_vm0, %v1854_v43  ;;  %v1872_v62 = vadd.f32 %v1623_v50, %v701_v54  ;;  %v703_v63 = vpop.f32.mrb[31].mxu1  ;;  %v765_v50 = vadd.s32 208, %v1613_v46 }
 0x14d   : > { %v895_v33 = vsel %vm495_vm0, %v850_v56, 0.0  ;;  %v951_v57 = vmul.f32 %v850_v56, %v850_v56  ;;  %v857_v39 = vsel %vm825_vm6, %v1698_v59, 0.0  ;;  %v799_v42 = vadd.s32 %v1615_v47, %v766_v4 }
 0x14e   : > { %v896_v6 = vadd.f32 %v895_v33, %v894_v35  ;;  %720 = vst.msk [vmem:[%s1631_s19 + $0x78] sm:$0xff] %vm495_vm0, %v638_v58  ;;  %v851_v7 = vsel %vm819_vm7, %v638_v58, 0.0  ;;  %736 = vst.msk [vmem:[%s1631_s19 + $0xf8] sm:$0xff] %vm495_vm0, %v1872_v62  ;;  %v798_v32 = vadd.s32 %v1615_v47, %v765_v50  ;;  %v1004_v9 = vsel %vm495_vm0, %v955_v30, 0.0 }
 0x14f   : > { %v996_v10 = vsel %vm495_vm0, %v951_v57, 0.0  ;;  %v897_v11 = vsel %vm495_vm0, %v851_v7, 0.0  ;;  %v952_v12 = vmul.f32 %v851_v7, %v851_v7  ;;  %v905_v49 = vsel %vm495_vm0, %v855_v24, 0.0 }
 0x150   : > { %v997_v45 = vadd.f32 %v996_v10, %v995_v40  ;;  %v898_v14 = vadd.f32 %v897_v11, %v896_v6  ;;  %v957_v44 = vmul.f32 %v856_v34, %v856_v34  ;;  %vm830_vm12 = vcmp.lt.s32.totalorder %v798_v32, 512 }
 0x151   : > { %v998_v21 = vsel %vm495_vm0, %v952_v12, 0.0  ;;  %v858_v52 = vsel %vm826_vm8, %v1714_v16, 0.0  ;;  %v767_v55 = vadd.s32 224, %v1613_v46  ;;  %v1006_v59 = vsel %vm495_vm0, %v956_v38, 0.0 }
 0x152   : > { %v900_v26 = vadd.f32 %v899_v17, %v898_v14  ;;  %v999_v28 = vadd.f32 %v998_v21, %v997_v45  ;;  %v907_v22 = vsel %vm495_vm0, %v856_v34, 0.0  ;;  %v958_v56 = vmul.f32 %v857_v39, %v857_v39 }
 0x153   : > { %v768_v58 = vadd.s32 232, %v1613_v46  ;;  %v859_v61 = vsel %vm827_vm9, %v1724_v25, 0.0  ;;  %vm831_vm13 = vcmp.lt.s32.totalorder %v799_v42, 512  ;;  %v1008_v16 = vsel %vm495_vm0, %v957_v44, 0.0 }
 0x154   : > { %v902_v35 = vadd.f32 %v901_v29, %v900_v26  ;;  %v1001_v36 = vadd.f32 %v1000_v19, %v999_v28  ;;  %v909_v37 = vsel %vm495_vm0, %v857_v39, 0.0  ;;  %v959_v57 = vmul.f32 %v858_v52, %v858_v52 }
 0x155   : > { %v769_v0 = vadd.s32 240, %v1613_v46  ;;  %v860_v3 = vsel %vm828_vm10, %v1740_v48, 0.0  ;;  %v800_v50 = vadd.s32 %v1615_v47, %v767_v55  ;;  %v1010_v51 = vsel %vm495_vm0, %v958_v56, 0.0 }
 0x156   : > { %v904_v40 = vadd.f32 %v903_v5, %v902_v35  ;;  %v1003_v41 = vadd.f32 %v1002_v27, %v1001_v36  ;;  %v911_v25 = vsel %vm495_vm0, %v858_v52, 0.0  ;;  %v960_v8 = vmul.f32 %v859_v61, %v859_v61 }
 0x157   : > { %v801_v10 = vadd.s32 %v1615_v47, %v768_v58  ;;  %v861_v1 = vsel %vm829_vm11, %v1750_v60, 0.0  ;;  %v770_v45 = vadd.s32 248, %v1613_v46  ;;  %v1012_v48 = vsel %vm495_vm0, %v959_v57, 0.0 }
 0x158   : > { %v906_v53 = vadd.f32 %v905_v49, %v904_v40  ;;  %v1005_v54 = vadd.f32 %v1004_v9, %v1003_v41  ;;  %v913_v14 = vsel %vm495_vm0, %v859_v61, 0.0  ;;  %v961_v15 = vmul.f32 %v860_v3, %v860_v3 }
 0x159   : > { %v802_v17 = vadd.s32 %v1615_v47, %v769_v0  ;;  %v862_v24 = vsel %vm830_vm12, %v1767_v20, 0.0  ;;  %vm832_vm14 = vcmp.lt.s32.totalorder %v800_v50, 512  ;;  %v1014_v26 = vsel %vm495_vm0, %v960_v8, 0.0 }
 0x15a   : > { %v1007_v63 = vadd.f32 %v1006_v59, %v1005_v54  ;;  %v908_v33 = vadd.f32 %v907_v22, %v906_v53  ;;  %v915_v23 = vsel %vm495_vm0, %v860_v3, 0.0  ;;  %v962_v60 = vmul.f32 %v861_v1, %v861_v1 }
 0x15b   : > { %vm833_vm15 = vcmp.lt.s32.totalorder %v801_v10, 512  ;;  %v863_v4 = vsel %vm831_vm13, %v1778_v31, 0.0  ;;  %v803_v19 = vadd.s32 %v1615_v47, %v770_v45  ;;  %v1016_v29 = vsel %vm495_vm0, %v961_v15, 0.0 }
 0x15c   : > { %v910_v6 = vadd.f32 %v909_v37, %v908_v33  ;;  %v1009_v7 = vadd.f32 %v1008_v16, %v1007_v63  ;;  %v917_v30 = vsel %vm495_vm0, %v861_v1, 0.0  ;;  %v963_v32 = vmul.f32 %v862_v24, %v862_v24 }
 0x15d   : > { %vm834_vm1 = vcmp.lt.s32.totalorder %v802_v17, 512  ;;  %v864_v35 = vsel %vm832_vm14, %v1806_v2, 0.0  ;;  %v1018_v36 = vsel %vm495_vm0, %v962_v60, 0.0  ;;  %v919_v27 = vsel %vm495_vm0, %v862_v24, 0.0 }
 0x15e   : > { %v912_v11 = vadd.f32 %v911_v25, %v910_v6  ;;  %v1011_v12 = vadd.f32 %v1010_v51, %v1009_v7  ;;  %v964_v5 = vmul.f32 %v863_v4, %v863_v4  ;;  %v865_v47 = vsel %vm833_vm15, %v1826_v13, 0.0 }
 0x15f   : > { %v866_v31 = vsel %vm834_vm1, %v1854_v43, 0.0  ;;  %v1020_v40 = vsel %vm495_vm0, %v963_v32, 0.0  ;;  %v921_v41 = vsel %vm495_vm0, %v863_v4, 0.0  ;;  %v965_v42 = vmul.f32 %v864_v35, %v864_v35 }
 0x160   : > { %v914_v18 = vadd.f32 %v913_v14, %v912_v11  ;;  %v1013_v21 = vadd.f32 %v1012_v48, %v1011_v12  ;;  %vm835_vm2 = vcmp.lt.s32.totalorder %v803_v19, 512  ;;  %v1022_v49 = vsel %vm495_vm0, %v964_v5, 0.0 }
 0x161   : > { %v923_v44 = vsel %vm495_vm0, %v864_v35, 0.0  ;;  %v966_v52 = vmul.f32 %v865_v47, %v865_v47  ;;  %v967_v53 = vmul.f32 %v866_v31, %v866_v31  ;;  %v867_v13 = vsel %vm835_vm2, %v1872_v62, 0.0 }
 0x162   : > { %v916_v46 = vadd.f32 %v915_v23, %v914_v18  ;;  %v1015_v28 = vadd.f32 %v1014_v26, %v1013_v21  ;;  %v1024_v43 = vsel %vm495_vm0, %v965_v42, 0.0  ;;  %v925_v59 = vsel %vm495_vm0, %v865_v47, 0.0 }
 0x163   : > { %v927_v22 = vsel %vm495_vm0, %v866_v31, 0.0  ;;  %v1026_v61 = vsel %vm495_vm0, %v966_v52, 0.0  ;;  %v1028_v63 = vsel %vm495_vm0, %v967_v53, 0.0  ;;  %v968_v33 = vmul.f32 %v867_v13, %v867_v13 }
 0x164   : > { %v1017_v20 = vadd.f32 %v1016_v29, %v1015_v28  ;;  %v918_v34 = vadd.f32 %v917_v30, %v916_v46  ;;  %v929_v57 = vsel %vm495_vm0, %v867_v13, 0.0  ;;  %vm1038_vm3 = vcmask 1040384  }
 0x165   : > { %v1030_v3 = vsel %vm495_vm0, %v968_v33, 0.0  ;;  %vm1040_vm0 = vcmask 517120  }
 0x166   : > { %v1019_v38 = vadd.f32 %v1018_v36, %v1017_v20  ;;  %v920_v39 = vadd.f32 %v919_v27, %v918_v34 }
 0x168   : > { %v1021_v9 = vadd.f32 %v1020_v40, %v1019_v38  ;;  %v922_v2 = vadd.f32 %v921_v41, %v920_v39 }
 0x16a   : > { %v1023_v54 = vadd.f32 %v1022_v49, %v1021_v9  ;;  %v924_v55 = vadd.f32 %v923_v44, %v922_v2 }
 0x16c   : > { %v1025_v56 = vadd.f32 %v1024_v43, %v1023_v54  ;;  %v926_v58 = vadd.f32 %v925_v59, %v924_v55 }
 0x16e   : > { %v1027_v16 = vadd.f32 %v1026_v61, %v1025_v56  ;;  %v928_v37 = vadd.f32 %v927_v22, %v926_v58 }
 0x170   : > { %v1029_v0 = vadd.f32 %v1028_v63, %v1027_v16  ;;  %v930_v62 = vadd.f32 %v929_v57, %v928_v37 }
 0x172   : > { %v931_v6 = vrot.slane %v930_v62, 4  ;;  %v1031_v7 = vadd.f32 %v1030_v3, %v1029_v0 }
 0x174   : > { %v932_v50 = vadd.f32 %v931_v6, %v930_v62  ;;  %v1032_v51 = vrot.slane %v1031_v7, 4 }
 0x176   : > { %v933_v25 = vrot.slane %v932_v50, 2  ;;  %v1033_v8 = vadd.f32 %v1032_v51, %v1031_v7 }
 0x178   : > { %v934_v10 = vadd.f32 %v933_v25, %v932_v50  ;;  %v1034_v11 = vrot.slane %v1033_v8, 2 }
 0x17a   : > { %v935_v12 = vrot.slane %v934_v10, 1  ;;  %v1035_v1 = vadd.f32 %v1034_v11, %v1033_v8 }
 0x17c   : > { %v1036_v45 = vrot.slane %v1035_v1, 1  ;;  %v936_v48 = vadd.f32 %v935_v12, %v934_v10 }
 0x17e   : > { %v1037_v14 = vadd.f32 %v1036_v45, %v1035_v1 }
 0x180   : > { %v1039_v15 = vsel %vm1038_vm3, %v936_v48, %v1037_v14 }
 0x181   : > { %1041 = vst.msk [vmem:[%s201_s7] sm:$0x3] %vm1040_vm0, %v1039_v15 }
 0x182   : > { %1363 = shalt.err (!%p1360_p3)
}
 0x183   : > { %s1364_s29 = scalar_lea.hbm %s1972_s12, 32  ;;  %s1368_s14 = scalar_lea.hbm %s2018_s4, 64 }
 0x184   : > { %p1365_p4 = scmp.ne.s32.totalorder %s1972_s12, %s1364_s29  ;;  %p1369_p9 = scmp.lt.u32.totalorder %s1972_s12, %s2018_s4 }
 0x185   : > { %p1370_p10 = scmp.lt.u32.totalorder %s1368_s14, %s1364_s29  ;;  %p1372_p12 = scmp.lt.u32.totalorder %s1364_s29, %s1972_s12 }
 0x186   : > { %p1366_p7 = pnand %p1365_p4, %p1479_p5 }
 0x187   : > { %p1371_p11 = por %p1370_p10, %p1369_p9 }
 0x188   : > { %p1367_p8 = pneg %p1366_p7 }
 0x189   : > { %p1373_p13 = por %p1372_p12, %p1371_p11 }
 0x18b   : > { %p1374_p0 = pnand %p1373_p13, %p1367_p8 }
 0x18d   : > { %1377 = shalt.err (!%p1374_p0)
}
 0x18e   : > { %1250 = dma.vmem_to_hbm [thread:$0]  (%p1479_p5), %s1974_s8, 32, %s1972_s12, %s1048_s13  }
 0x18f PF: > { %p1256_p1 = scmp.ge.s32.totalorder %s1412_s18, 2  ;;  %s1085_s6 = sand.u32 1, %s1400_s15  }
 0x190   : > { %s1086_s9 = scalar_lea.sflag [#allocation3], %s1085_s6 }
 0x191   : > { %p1253_p2 = pnand %p1256_p1, %p1483_p6 }
 0x193   : > { %1395 = dma.done.wait (!%p1253_p2), %s1086_s9, 32  }
 0x194   : > { %1397 = vsyncadd (!%p1253_p2), %s1086_s9, 4294967264  ;;  %p15_p3 = scmp.ge.s32.totalorder %s1466_s21, 4   ;;  %s2021_s15 = smov %s1404_s16 }
 0x195   : > { %s2022_s16 = smov %s1408_s17  ;;  %s2023_s17 = smov %s1477_s24 }
 0x196   : > { %s2024_s18 = smov %s1466_s21  ;;  %17 = sbr.rel (!%p15_p3) target bundleno = 3 (0x3), region = 79 }
 0x19d   :  { %1091 = vsyncpa [#allocation3], 1 }
 0x19e   :  { %1093 = vsyncpa [#allocation3 + $0x1], 1 }

</bundles_post_ra>
